<compile_context>
chip_gen: v6e
topology: v6e:2x2x1
jax: 0.10.0
libtpu: 0.0.40
codegen_flags: <defaults>
</compile_context>

<pallas_src>
import functools

import jax
import jax.numpy as jnp
from jax.experimental import pallas as pl
from jax.experimental.pallas import tpu as pltpu

_LANE = 128


def _conv_bn_relu_kernel(x_ref, w_ref, scale_ref, bias_ref, o_ref, *, k, th, wo):
    """One grid point = (cout_tile, batch, h_tile).

    x_ref:     (th + k - 1, wo + k - 1, Cin)  input row-window incl. halo (VMEM)
    w_ref:     (k*k, Cin, TCO)                weights for this Cout tile
    scale_ref: (1, TCO) f32                   folded BN scale = gamma/sqrt(var+eps)
    bias_ref:  (1, TCO) f32                   folded BN bias  = beta - mean*scale
    o_ref:     (th, wo, TCO)                  output tile (TCO multiple of 128)
    """
    cin = x_ref.shape[-1]
    tco = o_ref.shape[-1]
    m = th * wo

    # Accumulate in registers; single store at the end (no scratch RMW passes).
    acc = jnp.zeros((m, tco), jnp.float32)
    # Convolution as a sum of k*k shifted-patch matmuls:
    #   out[h, w, co] = sum_{kh,kw,ci} x_pad[h+kh, w+kw, ci] * W[kh, kw, ci, co]
    # TODO(synk): for very small Cin, an im2col over the k*k taps (K = k*k*Cin,
    # single matmul) would raise MXU K-occupancy further; kept per-tap for
    # lowering robustness.
    for kh in range(k):
        for kw in range(k):
            patch = x_ref[kh:kh + th, kw:kw + wo, :].reshape(m, cin)
            acc = acc + jnp.dot(patch, w_ref[kh * k + kw],
                                preferred_element_type=jnp.float32)

    # Fused BatchNorm (inference affine) + ReLU, kept in f32 (VPU-friendly on v5e).
    y = acc * scale_ref[...] + bias_ref[...]          # broadcast (1, TCO)
    y = jnp.maximum(y, 0.0)
    o_ref[...] = y.reshape(th, wo, tco).astype(o_ref.dtype)


def conv_bn_relu(x_nchw, weight, gamma, beta, running_mean, running_var, *,
                 k, stride=1, eps=1e-5, block_h=8, block_cout=_LANE,
                 compute_dtype=None):
    """Equivalent of convolution(k, Cin, Cout, stride=1, with_bn=True).forward
    with BatchNorm evaluated in inference mode (running statistics).

    compute_dtype: dtype of the MXU operands (e.g. jnp.bfloat16 on v6e/v7x);
    accumulation and the BN+ReLU epilogue stay in f32. block_cout may be set
    to 256 on v6e/v7x to match the wider MXU when Cout % 256 == 0.
    """
    assert stride == 1, "stride != 1 not implemented"
    assert k % 2 == 1, "even kernel sizes not supported (output shape differs)"
    # TODO(synk): training-mode BN (batch statistics) not implemented; uses
    # running stats (eval-mode forward) folded into a per-channel affine.

    N, Cin, H, W = x_nchw.shape
    Cout = weight.shape[0]
    assert weight.shape == (Cout, Cin, k, k)
    pad = (k - 1) // 2

    th = min(block_h, H)                      # output rows per tile
    n_h = -(-H // th)                         # cdiv
    h_pad = n_h * th                          # H rounded up to the row tile
    thp = th + 2 * pad                        # rows incl. halo
    wp = W + 2 * pad

    cout_p = -(-Cout // _LANE) * _LANE        # lane-dense Cout
    tco = min(block_cout, cout_p)
    assert cout_p % tco == 0
    n_co = cout_p // tco

    x_dt = compute_dtype if compute_dtype is not None else x_nchw.dtype

    # --- one fused relayout pass: NCHW -> NHWC, zero pad, overlapping row windows.
    x = jnp.transpose(x_nchw, (0, 2, 3, 1))                       # (N, H, W, Cin)
    x = jnp.pad(x, ((0, 0), (pad, pad + (h_pad - H)), (pad, pad), (0, 0)))
    row_idx = jnp.arange(n_h)[:, None] * th + jnp.arange(thp)[None, :]
    x_win = x[:, row_idx].astype(x_dt)                            # (N, n_h, thp, wp, Cin)
    # TODO(synk): fully fusing this relayout into the kernel (manual halo DMA
    # from an unpadded HBM ref) would remove the remaining wrapper HBM pass.

    # Weights: (Cout, Cin, k, k) -> (k*k, Cin, Cout_p), zero-padded channels.
    w = jnp.transpose(weight, (2, 3, 1, 0)).reshape(k * k, Cin, Cout)
    w = jnp.pad(w, ((0, 0), (0, 0), (0, cout_p - Cout))).astype(x_dt)

    inv = gamma / jnp.sqrt(running_var + eps)
    scale = jnp.pad(inv, (0, cout_p - Cout)).reshape(1, cout_p).astype(jnp.float32)
    bias = jnp.pad(beta - running_mean * inv,
                   (0, cout_p - Cout)).reshape(1, cout_p).astype(jnp.float32)

    kernel = functools.partial(_conv_bn_relu_kernel, k=k, th=th, wo=W)

    out = pl.pallas_call(
        kernel,
        out_shape=jax.ShapeDtypeStruct((N, n_h, th, W, cout_p), x_nchw.dtype),
        grid_spec=pltpu.PrefetchScalarGridSpec(
            num_scalar_prefetch=0,
            # cout tile outermost: the weight/scale/bias blocks keep the same
            # block index across all inner (batch, row-tile) steps -> no re-DMA.
            grid=(n_co, N, n_h),
            in_specs=[
                pl.BlockSpec((None, None, thp, wp, Cin),
                             lambda co, n, h: (n, h, 0, 0, 0)),
                pl.BlockSpec((k * k, Cin, tco), lambda co, n, h: (0, 0, co)),
                pl.BlockSpec((1, tco), lambda co, n, h: (0, co)),
                pl.BlockSpec((1, tco), lambda co, n, h: (0, co)),
            ],
            out_specs=pl.BlockSpec((None, None, th, W, tco),
                                   lambda co, n, h: (n, h, 0, 0, co)),
        ),
        compiler_params=pltpu.CompilerParams(
            dimension_semantics=("parallel", "parallel", "parallel"),
            vmem_limit_bytes=32 * 1024 * 1024),
    )(x_win, w, scale, bias)

    # (N, n_h, th, W, Cout_p) -> (N, H, W, Cout) -> NCHW.
    out = out.reshape(N, h_pad, W, cout_p)[:, :H, :, :Cout]
    return jnp.transpose(out, (0, 3, 1, 2))


def _reference(x_nchw, weight, gamma, beta, running_mean, running_var, *, k, eps=1e-5):
    pad = (k - 1) // 2
    conv = jax.lax.conv_general_dilated(
        x_nchw, weight, window_strides=(1, 1),
        padding=((pad, pad), (pad, pad)),
        dimension_numbers=("NCHW", "OIHW", "NCHW"))
    inv = gamma / jnp.sqrt(running_var + eps)
    bn = conv * inv[None, :, None, None] + (beta - running_mean * inv)[None, :, None, None]
    return jnp.maximum(bn, 0.0)


if __name__ == "__main__":
    key = jax.random.PRNGKey(0)
    k = 3
    N, Cin, Cout, H, W = 2, 4, 8, 16, 16

    k_x, k_w, k_g, k_b, k_m, k_v = jax.random.split(key, 6)
    x = jax.random.normal(k_x, (N, Cin, H, W), dtype=jnp.float32)
    weight = jax.random.normal(k_w, (Cout, Cin, k, k), dtype=jnp.float32) * 0.1
    gamma = jax.random.normal(k_g, (Cout,), dtype=jnp.float32) * 0.1 + 1.0
    beta = jax.random.normal(k_b, (Cout,), dtype=jnp.float32) * 0.1
    running_mean = jax.random.normal(k_m, (Cout,), dtype=jnp.float32) * 0.1
    running_var = jnp.abs(jax.random.normal(k_v, (Cout,), dtype=jnp.float32)) * 0.1 + 0.9

    ref = _reference(x, weight, gamma, beta, running_mean, running_var, k=k)

    # f32 path (exact-ish).
    f32_fn = jax.jit(functools.partial(conv_bn_relu, k=k))
    out = jax.block_until_ready(f32_fn(x, weight, gamma, beta, running_mean, running_var))
    assert out.shape == (N, Cout, H, W)
    assert jnp.allclose(out, ref, atol=1e-4, rtol=1e-4)

    # bf16 MXU-operand path (f32 accumulation + f32 BN/ReLU) — looser tolerance.
    bf16_fn = jax.jit(functools.partial(conv_bn_relu, k=k, compute_dtype=jnp.bfloat16))
    out_bf16 = jax.block_until_ready(
        bf16_fn(x, weight, gamma, beta, running_mean, running_var))
    assert jnp.allclose(out_bf16, ref, atol=5e-2, rtol=5e-2)

    print("KERNEL_OK")
</pallas_src>

<mosaic_0001>
module attributes {stable_mosaic.version = 11 : i64} {
  func.func @_conv_bn_relu_kernel(%arg0: i32, %arg1: i32, %arg2: i32, %arg3: memref<1x1x10x18x4xf32, #tpu.memory_space<vmem>>, %arg4: memref<9x4x128xf32, #tpu.memory_space<vmem>>, %arg5: memref<1x128xf32, #tpu.memory_space<vmem>>, %arg6: memref<1x128xf32, #tpu.memory_space<vmem>>, %arg7: memref<1x1x8x16x128xf32, #tpu.memory_space<vmem>>) attributes {dimension_semantics = [#tpu.dimension_semantics<parallel>, #tpu.dimension_semantics<parallel>, #tpu.dimension_semantics<parallel>], iteration_bounds = array<i64: 1, 2, 2>, scalar_prefetch = 0 : i64, scratch_operands = 0 : i64, tpu.core_type = #tpu.core_type<tc>, window_params = [{transform_indices = @transform_0, window_bounds = array<i64: 1, 1, 10, 18, 4>}, {transform_indices = @transform_1, window_bounds = array<i64: 9, 4, 128>}, {transform_indices = @transform_2, window_bounds = array<i64: 1, 128>}, {transform_indices = @transform_3, window_bounds = array<i64: 1, 128>}, {transform_indices = @transform_4, window_bounds = array<i64: 1, 1, 8, 16, 128>}]} {
    %cst = arith.constant 0.000000e+00 : f32
    %0 = vector.broadcast %cst : f32 to vector<128x128xf32>
    %c0 = arith.constant 0 : index
    %c0_0 = arith.constant 0 : index
    %c0_1 = arith.constant 0 : index
    %c0_2 = arith.constant 0 : index
    %c0_3 = arith.constant 0 : index
    %1 = vector.load %arg3[%c0, %c0_0, %c0_1, %c0_2, %c0_3] : memref<1x1x10x18x4xf32, #tpu.memory_space<vmem>>, vector<1x1x8x16x4xf32>
    %2 = vector.shape_cast %1 : vector<1x1x8x16x4xf32> to vector<8x16x4xf32>
    %3 = vector.shape_cast %2 : vector<8x16x4xf32> to vector<128x4xf32>
    %c0_4 = arith.constant 0 : index
    %c0_5 = arith.constant 0 : index
    %c0_6 = arith.constant 0 : index
    %4 = vector.load %arg4[%c0_4, %c0_5, %c0_6] : memref<9x4x128xf32, #tpu.memory_space<vmem>>, vector<1x4x128xf32>
    %5 = vector.shape_cast %4 : vector<1x4x128xf32> to vector<4x128xf32>
    %cst_7 = arith.constant dense<0.000000e+00> : vector<128x128xf32>
    %6 = tpu.matmul %3, %5, %cst_7 {dimension_numbers = #tpu.dot_dimension_numbers<[1], [0], [0], [1], [0, 0, 1, 1], [], []>} : vector<128x4xf32>, vector<4x128xf32>, vector<128x128xf32> -> vector<128x128xf32>
    %7 = arith.addf %0, %6 : vector<128x128xf32>
    %c0_8 = arith.constant 0 : index
    %c0_9 = arith.constant 0 : index
    %c0_10 = arith.constant 0 : index
    %c1 = arith.constant 1 : index
    %c0_11 = arith.constant 0 : index
    %8 = vector.load %arg3[%c0_8, %c0_9, %c0_10, %c1, %c0_11] : memref<1x1x10x18x4xf32, #tpu.memory_space<vmem>>, vector<1x1x8x16x4xf32>
    %9 = vector.shape_cast %8 : vector<1x1x8x16x4xf32> to vector<8x16x4xf32>
    %10 = vector.shape_cast %9 : vector<8x16x4xf32> to vector<128x4xf32>
    %c1_12 = arith.constant 1 : index
    %c0_13 = arith.constant 0 : index
    %c0_14 = arith.constant 0 : index
    %11 = vector.load %arg4[%c1_12, %c0_13, %c0_14] : memref<9x4x128xf32, #tpu.memory_space<vmem>>, vector<1x4x128xf32>
    %12 = vector.shape_cast %11 : vector<1x4x128xf32> to vector<4x128xf32>
    %cst_15 = arith.constant dense<0.000000e+00> : vector<128x128xf32>
    %13 = tpu.matmul %10, %12, %cst_15 {dimension_numbers = #tpu.dot_dimension_numbers<[1], [0], [0], [1], [0, 0, 1, 1], [], []>} : vector<128x4xf32>, vector<4x128xf32>, vector<128x128xf32> -> vector<128x128xf32>
    %14 = arith.addf %7, %13 : vector<128x128xf32>
    %c0_16 = arith.constant 0 : index
    %c0_17 = arith.constant 0 : index
    %c0_18 = arith.constant 0 : index
    %c2 = arith.constant 2 : index
    %c0_19 = arith.constant 0 : index
    %15 = vector.load %arg3[%c0_16, %c0_17, %c0_18, %c2, %c0_19] : memref<1x1x10x18x4xf32, #tpu.memory_space<vmem>>, vector<1x1x8x16x4xf32>
    %16 = vector.shape_cast %15 : vector<1x1x8x16x4xf32> to vector<8x16x4xf32>
    %17 = vector.shape_cast %16 : vector<8x16x4xf32> to vector<128x4xf32>
    %c2_20 = arith.constant 2 : index
    %c0_21 = arith.constant 0 : index
    %c0_22 = arith.constant 0 : index
    %18 = vector.load %arg4[%c2_20, %c0_21, %c0_22] : memref<9x4x128xf32, #tpu.memory_space<vmem>>, vector<1x4x128xf32>
    %19 = vector.shape_cast %18 : vector<1x4x128xf32> to vector<4x128xf32>
    %cst_23 = arith.constant dense<0.000000e+00> : vector<128x128xf32>
    %20 = tpu.matmul %17, %19, %cst_23 {dimension_numbers = #tpu.dot_dimension_numbers<[1], [0], [0], [1], [0, 0, 1, 1], [], []>} : vector<128x4xf32>, vector<4x128xf32>, vector<128x128xf32> -> vector<128x128xf32>
    %21 = arith.addf %14, %20 : vector<128x128xf32>
    %c0_24 = arith.constant 0 : index
    %c0_25 = arith.constant 0 : index
    %c1_26 = arith.constant 1 : index
    %c0_27 = arith.constant 0 : index
    %c0_28 = arith.constant 0 : index
    %22 = vector.load %arg3[%c0_24, %c0_25, %c1_26, %c0_27, %c0_28] : memref<1x1x10x18x4xf32, #tpu.memory_space<vmem>>, vector<1x1x8x16x4xf32>
    %23 = vector.shape_cast %22 : vector<1x1x8x16x4xf32> to vector<8x16x4xf32>
    %24 = vector.shape_cast %23 : vector<8x16x4xf32> to vector<128x4xf32>
    %c3 = arith.constant 3 : index
    %c0_29 = arith.constant 0 : index
    %c0_30 = arith.constant 0 : index
    %25 = vector.load %arg4[%c3, %c0_29, %c0_30] : memref<9x4x128xf32, #tpu.memory_space<vmem>>, vector<1x4x128xf32>
    %26 = vector.shape_cast %25 : vector<1x4x128xf32> to vector<4x128xf32>
    %cst_31 = arith.constant dense<0.000000e+00> : vector<128x128xf32>
    %27 = tpu.matmul %24, %26, %cst_31 {dimension_numbers = #tpu.dot_dimension_numbers<[1], [0], [0], [1], [0, 0, 1, 1], [], []>} : vector<128x4xf32>, vector<4x128xf32>, vector<128x128xf32> -> vector<128x128xf32>
    %28 = arith.addf %21, %27 : vector<128x128xf32>
    %c0_32 = arith.constant 0 : index
    %c0_33 = arith.constant 0 : index
    %c1_34 = arith.constant 1 : index
    %c1_35 = arith.constant 1 : index
    %c0_36 = arith.constant 0 : index
    %29 = vector.load %arg3[%c0_32, %c0_33, %c1_34, %c1_35, %c0_36] : memref<1x1x10x18x4xf32, #tpu.memory_space<vmem>>, vector<1x1x8x16x4xf32>
    %30 = vector.shape_cast %29 : vector<1x1x8x16x4xf32> to vector<8x16x4xf32>
    %31 = vector.shape_cast %30 : vector<8x16x4xf32> to vector<128x4xf32>
    %c4 = arith.constant 4 : index
    %c0_37 = arith.constant 0 : index
    %c0_38 = arith.constant 0 : index
    %32 = vector.load %arg4[%c4, %c0_37, %c0_38] : memref<9x4x128xf32, #tpu.memory_space<vmem>>, vector<1x4x128xf32>
    %33 = vector.shape_cast %32 : vector<1x4x128xf32> to vector<4x128xf32>
    %cst_39 = arith.constant dense<0.000000e+00> : vector<128x128xf32>
    %34 = tpu.matmul %31, %33, %cst_39 {dimension_numbers = #tpu.dot_dimension_numbers<[1], [0], [0], [1], [0, 0, 1, 1], [], []>} : vector<128x4xf32>, vector<4x128xf32>, vector<128x128xf32> -> vector<128x128xf32>
    %35 = arith.addf %28, %34 : vector<128x128xf32>
    %c0_40 = arith.constant 0 : index
    %c0_41 = arith.constant 0 : index
    %c1_42 = arith.constant 1 : index
    %c2_43 = arith.constant 2 : index
    %c0_44 = arith.constant 0 : index
    %36 = vector.load %arg3[%c0_40, %c0_41, %c1_42, %c2_43, %c0_44] : memref<1x1x10x18x4xf32, #tpu.memory_space<vmem>>, vector<1x1x8x16x4xf32>
    %37 = vector.shape_cast %36 : vector<1x1x8x16x4xf32> to vector<8x16x4xf32>
    %38 = vector.shape_cast %37 : vector<8x16x4xf32> to vector<128x4xf32>
    %c5 = arith.constant 5 : index
    %c0_45 = arith.constant 0 : index
    %c0_46 = arith.constant 0 : index
    %39 = vector.load %arg4[%c5, %c0_45, %c0_46] : memref<9x4x128xf32, #tpu.memory_space<vmem>>, vector<1x4x128xf32>
    %40 = vector.shape_cast %39 : vector<1x4x128xf32> to vector<4x128xf32>
    %cst_47 = arith.constant dense<0.000000e+00> : vector<128x128xf32>
    %41 = tpu.matmul %38, %40, %cst_47 {dimension_numbers = #tpu.dot_dimension_numbers<[1], [0], [0], [1], [0, 0, 1, 1], [], []>} : vector<128x4xf32>, vector<4x128xf32>, vector<128x128xf32> -> vector<128x128xf32>
    %42 = arith.addf %35, %41 : vector<128x128xf32>
    %c0_48 = arith.constant 0 : index
    %c0_49 = arith.constant 0 : index
    %c2_50 = arith.constant 2 : index
    %c0_51 = arith.constant 0 : index
    %c0_52 = arith.constant 0 : index
    %43 = vector.load %arg3[%c0_48, %c0_49, %c2_50, %c0_51, %c0_52] : memref<1x1x10x18x4xf32, #tpu.memory_space<vmem>>, vector<1x1x8x16x4xf32>
    %44 = vector.shape_cast %43 : vector<1x1x8x16x4xf32> to vector<8x16x4xf32>
    %45 = vector.shape_cast %44 : vector<8x16x4xf32> to vector<128x4xf32>
    %c6 = arith.constant 6 : index
    %c0_53 = arith.constant 0 : index
    %c0_54 = arith.constant 0 : index
    %46 = vector.load %arg4[%c6, %c0_53, %c0_54] : memref<9x4x128xf32, #tpu.memory_space<vmem>>, vector<1x4x128xf32>
    %47 = vector.shape_cast %46 : vector<1x4x128xf32> to vector<4x128xf32>
    %cst_55 = arith.constant dense<0.000000e+00> : vector<128x128xf32>
    %48 = tpu.matmul %45, %47, %cst_55 {dimension_numbers = #tpu.dot_dimension_numbers<[1], [0], [0], [1], [0, 0, 1, 1], [], []>} : vector<128x4xf32>, vector<4x128xf32>, vector<128x128xf32> -> vector<128x128xf32>
    %49 = arith.addf %42, %48 : vector<128x128xf32>
    %c0_56 = arith.constant 0 : index
    %c0_57 = arith.constant 0 : index
    %c2_58 = arith.constant 2 : index
    %c1_59 = arith.constant 1 : index
    %c0_60 = arith.constant 0 : index
    %50 = vector.load %arg3[%c0_56, %c0_57, %c2_58, %c1_59, %c0_60] : memref<1x1x10x18x4xf32, #tpu.memory_space<vmem>>, vector<1x1x8x16x4xf32>
    %51 = vector.shape_cast %50 : vector<1x1x8x16x4xf32> to vector<8x16x4xf32>
    %52 = vector.shape_cast %51 : vector<8x16x4xf32> to vector<128x4xf32>
    %c7 = arith.constant 7 : index
    %c0_61 = arith.constant 0 : index
    %c0_62 = arith.constant 0 : index
    %53 = vector.load %arg4[%c7, %c0_61, %c0_62] : memref<9x4x128xf32, #tpu.memory_space<vmem>>, vector<1x4x128xf32>
    %54 = vector.shape_cast %53 : vector<1x4x128xf32> to vector<4x128xf32>
    %cst_63 = arith.constant dense<0.000000e+00> : vector<128x128xf32>
    %55 = tpu.matmul %52, %54, %cst_63 {dimension_numbers = #tpu.dot_dimension_numbers<[1], [0], [0], [1], [0, 0, 1, 1], [], []>} : vector<128x4xf32>, vector<4x128xf32>, vector<128x128xf32> -> vector<128x128xf32>
    %56 = arith.addf %49, %55 : vector<128x128xf32>
    %c0_64 = arith.constant 0 : index
    %c0_65 = arith.constant 0 : index
    %c2_66 = arith.constant 2 : index
    %c2_67 = arith.constant 2 : index
    %c0_68 = arith.constant 0 : index
    %57 = vector.load %arg3[%c0_64, %c0_65, %c2_66, %c2_67, %c0_68] : memref<1x1x10x18x4xf32, #tpu.memory_space<vmem>>, vector<1x1x8x16x4xf32>
    %58 = vector.shape_cast %57 : vector<1x1x8x16x4xf32> to vector<8x16x4xf32>
    %59 = vector.shape_cast %58 : vector<8x16x4xf32> to vector<128x4xf32>
    %c8 = arith.constant 8 : index
    %c0_69 = arith.constant 0 : index
    %c0_70 = arith.constant 0 : index
    %60 = vector.load %arg4[%c8, %c0_69, %c0_70] : memref<9x4x128xf32, #tpu.memory_space<vmem>>, vector<1x4x128xf32>
    %61 = vector.shape_cast %60 : vector<1x4x128xf32> to vector<4x128xf32>
    %cst_71 = arith.constant dense<0.000000e+00> : vector<128x128xf32>
    %62 = tpu.matmul %59, %61, %cst_71 {dimension_numbers = #tpu.dot_dimension_numbers<[1], [0], [0], [1], [0, 0, 1, 1], [], []>} : vector<128x4xf32>, vector<4x128xf32>, vector<128x128xf32> -> vector<128x128xf32>
    %63 = arith.addf %56, %62 : vector<128x128xf32>
    %c0_72 = arith.constant 0 : index
    %c0_73 = arith.constant 0 : index
    %64 = vector.load %arg5[%c0_72, %c0_73] : memref<1x128xf32, #tpu.memory_space<vmem>>, vector<1x128xf32>
    %65 = vector.broadcast %64 : vector<1x128xf32> to vector<128x128xf32>
    %66 = arith.mulf %63, %65 : vector<128x128xf32>
    %c0_74 = arith.constant 0 : index
    %c0_75 = arith.constant 0 : index
    %67 = vector.load %arg6[%c0_74, %c0_75] : memref<1x128xf32, #tpu.memory_space<vmem>>, vector<1x128xf32>
    %68 = vector.broadcast %67 : vector<1x128xf32> to vector<128x128xf32>
    %69 = arith.addf %66, %68 : vector<128x128xf32>
    %cst_76 = arith.constant 0.000000e+00 : f32
    %70 = vector.broadcast %cst_76 : f32 to vector<128x128xf32>
    %71 = arith.maximumf %69, %70 : vector<128x128xf32>
    %72 = vector.shape_cast %71 : vector<128x128xf32> to vector<8x16x128xf32>
    %c0_77 = arith.constant 0 : index
    %c0_78 = arith.constant 0 : index
    %c0_79 = arith.constant 0 : index
    %c0_80 = arith.constant 0 : index
    %c0_81 = arith.constant 0 : index
    %73 = vector.load %arg7[%c0_77, %c0_78, %c0_79, %c0_80, %c0_81] : memref<1x1x8x16x128xf32, #tpu.memory_space<vmem>>, vector<1x1x8x16x128xf32>
    %74 = vector.shape_cast %73 : vector<1x1x8x16x128xf32> to vector<8x16x128xf32>
    %75 = vector.shape_cast %72 : vector<8x16x128xf32> to vector<1x1x8x16x128xf32>
    tpu.vector_store %arg7[%c0_77, %c0_78, %c0_79, %c0_80, %c0_81], %75 {strides = array<i32>} : memref<1x1x8x16x128xf32, #tpu.memory_space<vmem>>, vector<1x1x8x16x128xf32>,
    return
  }
  func.func @transform_0(%arg0: i32, %arg1: i32, %arg2: i32) -> (i32, i32, i32, i32, i32) {
    %c0_i32 = arith.constant 0 : i32
    %c0_i32_0 = arith.constant 0 : i32
    %c0_i32_1 = arith.constant 0 : i32
    %c0_i32_2 = arith.constant 0 : i32
    return %arg1, %arg2, %c0_i32, %c0_i32_0, %c0_i32_1 : i32, i32, i32, i32, i32
  }
  func.func @transform_1(%arg0: i32, %arg1: i32, %arg2: i32) -> (i32, i32, i32) {
    %c0_i32 = arith.constant 0 : i32
    %c0_i32_0 = arith.constant 0 : i32
    %c0_i32_1 = arith.constant 0 : i32
    return %c0_i32, %c0_i32_0, %arg0 : i32, i32, i32
  }
  func.func @transform_2(%arg0: i32, %arg1: i32, %arg2: i32) -> (i32, i32) {
    %c0_i32 = arith.constant 0 : i32
    %c0_i32_0 = arith.constant 0 : i32
    return %c0_i32, %arg0 : i32, i32
  }
  func.func @transform_3(%arg0: i32, %arg1: i32, %arg2: i32) -> (i32, i32) {
    %c0_i32 = arith.constant 0 : i32
    %c0_i32_0 = arith.constant 0 : i32
    return %c0_i32, %arg0 : i32, i32
  }
  func.func @transform_4(%arg0: i32, %arg1: i32, %arg2: i32) -> (i32, i32, i32, i32, i32) {
    %c0_i32 = arith.constant 0 : i32
    %c0_i32_0 = arith.constant 0 : i32
    %c0_i32_1 = arith.constant 0 : i32
    return %arg1, %arg2, %c0_i32, %c0_i32_0, %arg0 : i32, i32, i32, i32, i32
  }
}

</mosaic_0001>

<bundles_post_ra>
// kernel: conv_bn_relu.1
= control target key start
LH: loop header
LB: loop body
LE: loop exit
PB: predicated region body
PF: predicated region fallthrough
CT: control target
= control target key end

     0   :  { %s3330_s15 = smov 0   ;;  %s3332_s16 = smov 0   ;;  %s4116_s0 = inlined_call_operand.vmem [shape: f32[2,2,10,18,4], index: 0, kind: input, shape index: {}]   ;;  %s4117_s1 = inlined_call_operand.vmem [shape: f32[9,4,128], index: 1, kind: input, shape index: {}]   ;;  %s4118_s2 = inlined_call_operand.vmem [shape: f32[1,128], index: 2, kind: input, shape index: {}]   ;;  %s4119_s3 = inlined_call_operand.vmem [shape: f32[1,128], index: 3, kind: input, shape index: {}]   ;;  %s4120_s4 = inlined_call_operand.vmem [shape: f32[2,2,8,16,128], index: 4, kind: output, shape index: {}]  }
   0x1   :  { %s3334_s17 = smov 0   ;;  %s3336_s18 = smov 0  }
   0x2   :  { %s3338_s19 = smov 0  }
   0x3 LB: > { %s26_s20 = sadd.s32 1, %s3295_s17  ;;  %s29_s21 = sadd.s32 1, %s3299_s18  ;;  %s3303_s19 = sphi %s3338_s19, %s14_s19   ;;  %s3299_s18 = sphi %s3336_s18, %s4162_s18   ;;  %s3295_s17 = sphi %s3334_s17, %s4161_s17   ;;  %s3291_s16 = sphi %s3332_s16, %s4160_s16   ;;  %s3287_s15 = sphi %s3330_s15, %s4159_s15  }
   0x4   : > { %p27_p0 = scmp.ge.s32.totalorder %s26_s20, 2  ;;  %p2568_p1 = scmp.ge.s32.totalorder %s3303_s19, 1 }
   0x5   : > { %p216_p2 = scmp.lt.s32.totalorder %s3303_s19, 5 }
   0x6   : > { %s4164_s20 = smov (%p27_p0, %s26_s20), 0  ;;  %s4166_s21 = smov (!%p27_p0, %s29_s21), %s3299_s18 }
   0x7   : > { %p217_p3 = pnand %p2568_p1, %p216_p2  ;;  %p31_p4 = scmp.ge.s32.totalorder %s4166_s21, 2 }
   0x9   : > { %s4168_s21 = smov (%p31_p4, %s4166_s21), 0  ;;  %220 = sbr.rel (%p217_p3) target bundleno = 372 (0x174), region = 36 }
   0xe   : > { %v2573_v0 = vld [vmem:[%s4117_s1 + $0x4] sm:$0xf]  ;;  %vm378_vm0 = vcmask 1043456   ;;  %p263_p5 = scmp.lt.s32.totalorder %s3291_s16, 1  ;;  %p265_p6 = scmp.lt.s32.totalorder %s3287_s15, 1  ;;  %vm329_vm1 = vcmask 31744  }
   0xf   : > { %3221 = vmatprep.subr.msk.mxu1 %vm378_vm0, %v2573_v0  ;;  %2987 = vmatprep.subr.msk.mxu0 %vm378_vm0, %v2573_v0  ;;  %v310_v1 = vld [vmem:[%s4117_s1] sm:$0xf]  ;;  %v2608_v2 = vld [vmem:[%s4117_s1 + $0x8] sm:$0xf]  ;;  %v2642_v9 = vld [vmem:[%s4117_s1 + $0xc] sm:$0xf] }
  0x10   : > { %3222 = vmatpush3.msk.msra.mxu1 %vm378_vm0, %v2573_v0  ;;  %2988 = vmatpush3.msk.msra.mxu0 %vm378_vm0, %v2573_v0  ;;  %s4170_s16 = smov (!%p263_p5, %s3291_s16), 1  ;;  %s4172_s15 = smov (!%p265_p6, %s3287_s15), 1  ;;  %v2676_v10 = vld [vmem:[%s4117_s1 + $0x10] sm:$0xf]  ;;  %v3487_v27 = vld [vmem:[%s4117_s1 + $0x14] sm:$0xf] }
  0x11   : > { %3013 = vmatprep.subr.msk.mxu1 %vm378_vm0, %v310_v1  ;;  %3039 = vmatprep.subr.msk.mxu0 %vm378_vm0, %v2608_v2  ;;  %s3224_s28 = smul.u32 60, %s4170_s16  ;;  %v3492_v28 = vld [vmem:[%s4117_s1 + $0x18] sm:$0xf]  ;;  %v2778_v55 = vld [vmem:[%s4117_s1 + $0x1c] sm:$0xf] }
  0x12   : > { %s3223_s29 = smul.u32 30, %s4172_s15  ;;  %v2812_v56 = vld [vmem:[%s4117_s1 + $0x20] sm:$0xf] }
  0x14   : > { %s269_s30 = sadd.s32 %s3224_s28, %s3223_s29  ;;  %s2570_s28 = sshll.u32 %s4172_s15, 4 }
  0x15   : > { %s2569_s5 = sshll.u32 %s269_s30, 3  ;;  %s2571_s29 = sshll.u32 %s4170_s16, 5 }
  0x16   : > { %s3384_s8 = scalar_lea.vmem %s4116_s0, %s2569_s5  ;;  %s3992_s15 = sadd.s32 %s2571_s29, %s2570_s28 }
  0x17   : > { %v311_v3 = vld [vmem:[%s3384_s8 + $0x1] sm:$0xff]  ;;  %v312_v5 = vld [vmem:[%s3384_s8 + $0x9] sm:$0xff]  ;;  %v3398_v7 = vld [vmem:[%s3384_s8 + $0x19] sm:$0xff]  ;;  %s2572_s7 = sshll.u32 %s3992_s15, 3 }
  0x18   : > { %v3388_v4 = vld [vmem:[%s3384_s8 + $0x61] sm:$0xff]  ;;  %2989 = vmatprep.mubr.msk.f32.mxu0 %vm329_vm1, %v311_v3  ;;  %v3395_v6 = vld [vmem:[%s3384_s8 + $0x69] sm:$0xff]  ;;  %v3401_v8 = vld [vmem:[%s3384_s8 + $0x79] sm:$0xff]  ;;  %s4027_s10 = scalar_lea.vmem %s4120_s4, %s2572_s7 }
  0x19   : > { %3001 = vmatprep.mubr.msk.f32.mxu1 %vm329_vm1, %v3388_v4  ;;  %2990 = vmatmul.mubr.msk.f32.vlgmr.msra.gmra.mxu0 %vm329_vm1, %v312_v5  ;;  %v3415_v11 = vld [vmem:[%s3384_s8 + $0x21] sm:$0xff]  ;;  %v3425_v13 = vld [vmem:[%s3384_s8 + $0x31] sm:$0xff]  ;;  %v3441_v15 = vld [vmem:[%s3384_s8 + $0x39] sm:$0xff] }
  0x1a   : > { %3002 = vmatmul.mubr.msk.f32.vlgmr.msra.gmra.mxu1 %vm329_vm1, %v3395_v6  ;;  %3040 = vmatpush3.msk.msra.mxu0 %vm378_vm0, %v2608_v2  ;;  %v3418_v12 = vld [vmem:[%s3384_s8 + $0x81] sm:$0xff]  ;;  %v3428_v14 = vld [vmem:[%s3384_s8 + $0x91] sm:$0xff]  ;;  %v3444_v16 = vld [vmem:[%s3384_s8 + $0x99] sm:$0xff] }
  0x1b   : > { %3014 = vmatpush3.msk.msra.mxu1 %vm378_vm0, %v310_v1  ;;  %2992 = vmatprep.mubr.msk.f32.mxu0 %vm329_vm1, %v3398_v7  ;;  %v3447_v17 = vld [vmem:[%s3384_s8 + $0x49] sm:$0xff]  ;;  %v3461_v19 = vld [vmem:[%s3384_s8 + $0x51] sm:$0xff]  ;;  %v294_v21 = vld [vmem:[%s3384_s8] sm:$0xff] }
  0x1c   : > { %3004 = vmatprep.mubr.msk.f32.mxu1 %vm329_vm1, %v3401_v8  ;;  %3065 = vmatprep.subr.msk.mxu1 %vm378_vm0, %v2642_v9  ;;  %v3450_v18 = vld [vmem:[%s3384_s8 + $0xa9] sm:$0xff]  ;;  %v3464_v20 = vld [vmem:[%s3384_s8 + $0xb1] sm:$0xff]  ;;  %v3480_v26 = vld [vmem:[%s3384_s8 + $0x1a] sm:$0xff] }
  0x1d   : > { %3091 = vmatprep.subr.msk.mxu0 %vm378_vm0, %v2676_v10  ;;  %2993 = vmatmul.mubr.msk.f32.gmra.mxu0 %vm329_vm1, %v3415_v11  ;;  %v723_v22 = vld [vmem:[%s3384_s8 + $0x2] sm:$0xff]  ;;  %v724_v24 = vld [vmem:[%s3384_s8 + $0xa] sm:$0xff]  ;;  %v3477_v25 = vld [vmem:[%s3384_s8 + $0x18] sm:$0xff] }
  0x1e   : > { %3005 = vmatmul.mubr.msk.f32.gmra.mxu1 %vm329_vm1, %v3418_v12  ;;  %2995 = vmatprep.mubr.msk.f32.mxu0 %vm329_vm1, %v3425_v13  ;;  %v295_v23 = vld [vmem:[%s3384_s8 + $0x8] sm:$0xff]  ;;  %v297_v29 = vld [vmem:[%s3384_s8 + $0x20] sm:$0xff]  ;;  %v3505_v31 = vld [vmem:[%s3384_s8 + $0x30] sm:$0xff] }
  0x1f   : > { %3007 = vmatprep.mubr.msk.f32.mxu1 %vm329_vm1, %v3428_v14  ;;  %v3498_v30 = vld [vmem:[%s3384_s8 + $0x22] sm:$0xff]  ;;  %v3508_v32 = vld [vmem:[%s3384_s8 + $0x32] sm:$0xff]  ;;  %v3525_v34 = vld [vmem:[%s3384_s8 + $0x3a] sm:$0xff] }
  0x20   : > { %v3522_v33 = vld [vmem:[%s3384_s8 + $0x38] sm:$0xff]  ;;  %v3528_v35 = vld [vmem:[%s3384_s8 + $0x48] sm:$0xff]  ;;  %v3542_v37 = vld [vmem:[%s3384_s8 + $0x50] sm:$0xff] }
  0x21   : > { %2996 = vmatmul.mubr.msk.f32.gmra.mxu0 %vm329_vm1, %v3441_v15  ;;  %v3531_v36 = vld [vmem:[%s3384_s8 + $0x4a] sm:$0xff]  ;;  %v3545_v38 = vld [vmem:[%s3384_s8 + $0x52] sm:$0xff]  ;;  %v3548_v39 = vld [vmem:[%s3384_s8 + $0x60] sm:$0xff] }
  0x22   : > { %3008 = vmatmul.mubr.msk.f32.gmra.mxu1 %vm329_vm1, %v3444_v16  ;;  %2998 = vmatprep.mubr.msk.f32.mxu0 %vm329_vm1, %v3447_v17  ;;  %v3551_v40 = vld [vmem:[%s3384_s8 + $0x62] sm:$0xff]  ;;  %v3565_v42 = vld [vmem:[%s3384_s8 + $0x6a] sm:$0xff]  ;;  %v3568_v43 = vld [vmem:[%s3384_s8 + $0x78] sm:$0xff] }
  0x23   : > { %3010 = vmatprep.mubr.msk.f32.mxu1 %vm329_vm1, %v3450_v18  ;;  %v3562_v41 = vld [vmem:[%s3384_s8 + $0x68] sm:$0xff]  ;;  %v3571_v44 = vld [vmem:[%s3384_s8 + $0x7a] sm:$0xff]  ;;  %v3588_v47 = vld [vmem:[%s3384_s8 + $0x90] sm:$0xff] }
  0x24   : > { %v3582_v45 = vld [vmem:[%s3384_s8 + $0x80] sm:$0xff]  ;;  %v3591_v48 = vld [vmem:[%s3384_s8 + $0x92] sm:$0xff]  ;;  %v3608_v51 = vld [vmem:[%s3384_s8 + $0xa8] sm:$0xff] }
  0x25   : > { %2999 = vmatmul.mubr.msk.f32.gmra.mxu0 %vm329_vm1, %v3461_v19  ;;  %v3585_v46 = vld [vmem:[%s3384_s8 + $0x82] sm:$0xff]  ;;  %v3602_v49 = vld [vmem:[%s3384_s8 + $0x98] sm:$0xff]  ;;  %v3611_v52 = vld [vmem:[%s3384_s8 + $0xaa] sm:$0xff] }
  0x26   : > { %3011 = vmatmul.mubr.msk.f32.gmra.mxu1 %vm329_vm1, %v3464_v20  ;;  %3041 = vmatprep.mubr.msk.f32.mxu0 %vm329_vm1, %v723_v22  ;;  %v3605_v50 = vld [vmem:[%s3384_s8 + $0x9a] sm:$0xff]  ;;  %v3622_v53 = vld [vmem:[%s3384_s8 + $0xb0] sm:$0xff]  ;;  %v2641_v59 = vld [vmem:[%s3384_s8 + $0xc8] sm:$0xff] }
  0x27   : > { %3015 = vmatprep.mubr.msk.f32.mxu1 %vm329_vm1, %v294_v21  ;;  %v3625_v54 = vld [vmem:[%s3384_s8 + $0xb2] sm:$0xff]  ;;  %v2640_v57 = vld [vmem:[%s3384_s8 + $0xc0] sm:$0xff]  ;;  %v3707_v60 = vld [vmem:[%s3384_s8 + $0xc9] sm:$0xff] }
  0x28   : > { %v3696_v58 = vld [vmem:[%s3384_s8 + $0xc1] sm:$0xff]  ;;  %v2742_v62 = vld [vmem:[%s3384_s8 + $0xd8] sm:$0xff]  ;;  %v2709_v63 = vld [vmem:[%s3384_s8 + $0xca] sm:$0xff] }
  0x29   : > { %3042 = vmatmul.mubr.msk.f32.vlgmr.msra.gmra.mxu0 %vm329_vm1, %v724_v24  ;;  %v2708_v61 = vld [vmem:[%s3384_s8 + $0xc2] sm:$0xff]  ;;  %v2776_v1 = vld [vmem:[%s3384_s8 + $0xd9] sm:$0xff] }
  0x2a   : > { %3016 = vmatmul.mubr.msk.f32.vlgmr.msra.gmra.mxu1 %vm329_vm1, %v295_v23  ;;  %3092 = vmatpush3.msk.msra.mxu0 %vm378_vm0, %v2676_v10  ;;  %v2743_v0 = vld [vmem:[%s3384_s8 + $0xe0] sm:$0xff] }
  0x2b   : > { %3066 = vmatpush3.msk.msra.mxu1 %vm378_vm0, %v2642_v9  ;;  %3018 = vmatprep.mubr.msk.f32.mxu1 %vm329_vm1, %v3477_v25  ;;  %v2810_v2 = vld [vmem:[%s3384_s8 + $0xda] sm:$0xff] }
  0x2c   : > { %3044 = vmatprep.mubr.msk.f32.mxu0 %vm329_vm1, %v3480_v26  ;;  %3117 = vmatprep.subr.msk.mxu1 %vm378_vm0, %v3487_v27  ;;  %v2777_v3 = vld [vmem:[%s3384_s8 + $0xe1] sm:$0xff] }
  0x2d   : > { %3143 = vmatprep.subr.msk.mxu0 %vm378_vm0, %v3492_v28  ;;  %3045 = vmatmul.mubr.msk.f32.gmra.mxu0 %vm329_vm1, %v3498_v30 }
  0x2e   : > { %3019 = vmatmul.mubr.msk.f32.gmra.mxu1 %vm329_vm1, %v297_v29  ;;  %3047 = vmatprep.mubr.msk.f32.mxu0 %vm329_vm1, %v3508_v32 }
  0x2f   : > { %3021 = vmatprep.mubr.msk.f32.mxu1 %vm329_vm1, %v3505_v31 }
  0x31   : > { %3048 = vmatmul.mubr.msk.f32.gmra.mxu0 %vm329_vm1, %v3525_v34 }
  0x32   : > { %3022 = vmatmul.mubr.msk.f32.gmra.mxu1 %vm329_vm1, %v3522_v33  ;;  %3050 = vmatprep.mubr.msk.f32.mxu0 %vm329_vm1, %v3531_v36 }
  0x33   : > { %3024 = vmatprep.mubr.msk.f32.mxu1 %vm329_vm1, %v3528_v35 }
  0x35   : > { %3051 = vmatmul.mubr.msk.f32.gmra.mxu0 %vm329_vm1, %v3545_v38 }
  0x36   : > { %3025 = vmatmul.mubr.msk.f32.gmra.mxu1 %vm329_vm1, %v3542_v37  ;;  %3053 = vmatprep.mubr.msk.f32.mxu0 %vm329_vm1, %v3551_v40 }
  0x37   : > { %3027 = vmatprep.mubr.msk.f32.mxu1 %vm329_vm1, %v3548_v39 }
  0x39   : > { %3054 = vmatmul.mubr.msk.f32.gmra.mxu0 %vm329_vm1, %v3565_v42 }
  0x3a   : > { %3028 = vmatmul.mubr.msk.f32.gmra.mxu1 %vm329_vm1, %v3562_v41  ;;  %3056 = vmatprep.mubr.msk.f32.mxu0 %vm329_vm1, %v3571_v44 }
  0x3b   : > { %3030 = vmatprep.mubr.msk.f32.mxu1 %vm329_vm1, %v3568_v43 }
  0x3d   : > { %3057 = vmatmul.mubr.msk.f32.gmra.mxu0 %vm329_vm1, %v3585_v46 }
  0x3e   : > { %3031 = vmatmul.mubr.msk.f32.gmra.mxu1 %vm329_vm1, %v3582_v45  ;;  %3059 = vmatprep.mubr.msk.f32.mxu0 %vm329_vm1, %v3591_v48 }
  0x3f   : > { %3033 = vmatprep.mubr.msk.f32.mxu1 %vm329_vm1, %v3588_v47 }
  0x41   : > { %3060 = vmatmul.mubr.msk.f32.gmra.mxu0 %vm329_vm1, %v3605_v50 }
  0x42   : > { %3034 = vmatmul.mubr.msk.f32.gmra.mxu1 %vm329_vm1, %v3602_v49  ;;  %3062 = vmatprep.mubr.msk.f32.mxu0 %vm329_vm1, %v3611_v52 }
  0x43   : > { %3036 = vmatprep.mubr.msk.f32.mxu1 %vm329_vm1, %v3608_v51 }
  0x45   : > { %3063 = vmatmul.mubr.msk.f32.gmra.mxu0 %vm329_vm1, %v3625_v54 }
  0x46   : > { %3037 = vmatmul.mubr.msk.f32.gmra.mxu1 %vm329_vm1, %v3622_v53  ;;  %3093 = vmatprep.mubr.msk.f32.mxu0 %vm329_vm1, %v3398_v7 }
  0x47   : > { %3067 = vmatprep.mubr.msk.f32.mxu1 %vm329_vm1, %v3477_v25 }
  0x49   : > { %3094 = vmatmul.mubr.msk.f32.vlgmr.msra.gmra.mxu0 %vm329_vm1, %v3415_v11 }
  0x4a   : > { %3068 = vmatmul.mubr.msk.f32.vlgmr.msra.gmra.mxu1 %vm329_vm1, %v297_v29  ;;  %3144 = vmatpush3.msk.msra.mxu0 %vm378_vm0, %v3492_v28 }
  0x4b   : > { %3118 = vmatpush3.msk.msra.mxu1 %vm378_vm0, %v3487_v27  ;;  %3070 = vmatprep.mubr.msk.f32.mxu1 %vm329_vm1, %v3505_v31 }
  0x4c   : > { %3096 = vmatprep.mubr.msk.f32.mxu0 %vm329_vm1, %v3425_v13  ;;  %3169 = vmatprep.subr.msk.mxu1 %vm378_vm0, %v2778_v55 }
  0x4d   : > { %3195 = vmatprep.subr.msk.mxu0 %vm378_vm0, %v2812_v56  ;;  %3097 = vmatmul.mubr.msk.f32.gmra.mxu0 %vm329_vm1, %v3441_v15 }
  0x4e   : > { %3071 = vmatmul.mubr.msk.f32.gmra.mxu1 %vm329_vm1, %v3522_v33  ;;  %3099 = vmatprep.mubr.msk.f32.mxu0 %vm329_vm1, %v3447_v17 }
  0x4f   : > { %3073 = vmatprep.mubr.msk.f32.mxu1 %vm329_vm1, %v3528_v35 }
  0x51   : > { %3100 = vmatmul.mubr.msk.f32.gmra.mxu0 %vm329_vm1, %v3461_v19 }
  0x52   : > { %3074 = vmatmul.mubr.msk.f32.gmra.mxu1 %vm329_vm1, %v3542_v37  ;;  %3102 = vmatprep.mubr.msk.f32.mxu0 %vm329_vm1, %v3388_v4 }
  0x53   : > { %3076 = vmatprep.mubr.msk.f32.mxu1 %vm329_vm1, %v3548_v39 }
  0x55   : > { %3103 = vmatmul.mubr.msk.f32.gmra.mxu0 %vm329_vm1, %v3395_v6 }
  0x56   : > { %3077 = vmatmul.mubr.msk.f32.gmra.mxu1 %vm329_vm1, %v3562_v41  ;;  %3105 = vmatprep.mubr.msk.f32.mxu0 %vm329_vm1, %v3401_v8 }
  0x57   : > { %3079 = vmatprep.mubr.msk.f32.mxu1 %vm329_vm1, %v3568_v43 }
  0x59   : > { %3106 = vmatmul.mubr.msk.f32.gmra.mxu0 %vm329_vm1, %v3418_v12 }
  0x5a   : > { %3080 = vmatmul.mubr.msk.f32.gmra.mxu1 %vm329_vm1, %v3582_v45  ;;  %3108 = vmatprep.mubr.msk.f32.mxu0 %vm329_vm1, %v3428_v14 }
  0x5b   : > { %3082 = vmatprep.mubr.msk.f32.mxu1 %vm329_vm1, %v3588_v47 }
  0x5d   : > { %3109 = vmatmul.mubr.msk.f32.gmra.mxu0 %vm329_vm1, %v3444_v16 }
  0x5e   : > { %3083 = vmatmul.mubr.msk.f32.gmra.mxu1 %vm329_vm1, %v3602_v49  ;;  %3111 = vmatprep.mubr.msk.f32.mxu0 %vm329_vm1, %v3450_v18 }
  0x5f   : > { %3085 = vmatprep.mubr.msk.f32.mxu1 %vm329_vm1, %v3608_v51 }
  0x61   : > { %3112 = vmatmul.mubr.msk.f32.gmra.mxu0 %vm329_vm1, %v3464_v20 }
  0x62   : > { %3086 = vmatmul.mubr.msk.f32.gmra.mxu1 %vm329_vm1, %v3622_v53  ;;  %3114 = vmatprep.mubr.msk.f32.mxu0 %vm329_vm1, %v3696_v58 }
  0x63   : > { %3088 = vmatprep.mubr.msk.f32.mxu1 %vm329_vm1, %v2640_v57 }
  0x65   : > { %3115 = vmatmul.mubr.msk.f32.gmra.mxu0 %vm329_vm1, %v3707_v60 }
  0x66   : > { %3089 = vmatmul.mubr.msk.f32.gmra.mxu1 %vm329_vm1, %v2641_v59  ;;  %3145 = vmatprep.mubr.msk.f32.mxu0 %vm329_vm1, %v3505_v31 }
  0x67   : > { %3119 = vmatprep.mubr.msk.f32.mxu1 %vm329_vm1, %v3480_v26 }
  0x69   : > { %3146 = vmatmul.mubr.msk.f32.vlgmr.msra.gmra.mxu0 %vm329_vm1, %v3522_v33 }
  0x6a   : > { %3120 = vmatmul.mubr.msk.f32.vlgmr.msra.gmra.mxu1 %vm329_vm1, %v3498_v30  ;;  %3196 = vmatpush3.msk.msra.mxu0 %vm378_vm0, %v2812_v56 }
  0x6b   : > { %3170 = vmatpush3.msk.msra.mxu1 %vm378_vm0, %v2778_v55  ;;  %3122 = vmatprep.mubr.msk.f32.mxu1 %vm329_vm1, %v3508_v32 }
  0x6c   : > { %3148 = vmatprep.mubr.msk.f32.mxu0 %vm329_vm1, %v3528_v35 }
  0x6d   : > { %3149 = vmatmul.mubr.msk.f32.gmra.mxu0 %vm329_vm1, %v3542_v37 }
  0x6e   : > { %3123 = vmatmul.mubr.msk.f32.gmra.mxu1 %vm329_vm1, %v3525_v34  ;;  %3151 = vmatprep.mubr.msk.f32.mxu0 %vm329_vm1, %v3548_v39 }
  0x6f   : > { %3125 = vmatprep.mubr.msk.f32.mxu1 %vm329_vm1, %v3531_v36 }
  0x71   : > { %3152 = vmatmul.mubr.msk.f32.gmra.mxu0 %vm329_vm1, %v3562_v41 }
  0x72   : > { %3126 = vmatmul.mubr.msk.f32.gmra.mxu1 %vm329_vm1, %v3545_v38  ;;  %3154 = vmatprep.mubr.msk.f32.mxu0 %vm329_vm1, %v3568_v43 }
  0x73   : > { %3128 = vmatprep.mubr.msk.f32.mxu1 %vm329_vm1, %v3551_v40 }
  0x75   : > { %3155 = vmatmul.mubr.msk.f32.gmra.mxu0 %vm329_vm1, %v3582_v45 }
  0x76   : > { %3129 = vmatmul.mubr.msk.f32.gmra.mxu1 %vm329_vm1, %v3565_v42  ;;  %3157 = vmatprep.mubr.msk.f32.mxu0 %vm329_vm1, %v3588_v47 }
  0x77   : > { %3131 = vmatprep.mubr.msk.f32.mxu1 %vm329_vm1, %v3571_v44 }
  0x79   : > { %3158 = vmatmul.mubr.msk.f32.gmra.mxu0 %vm329_vm1, %v3602_v49 }
  0x7a   : > { %3132 = vmatmul.mubr.msk.f32.gmra.mxu1 %vm329_vm1, %v3585_v46  ;;  %3160 = vmatprep.mubr.msk.f32.mxu0 %vm329_vm1, %v3608_v51 }
  0x7b   : > { %3134 = vmatprep.mubr.msk.f32.mxu1 %vm329_vm1, %v3591_v48 }
  0x7d   : > { %3161 = vmatmul.mubr.msk.f32.gmra.mxu0 %vm329_vm1, %v3622_v53 }
  0x7e   : > { %3135 = vmatmul.mubr.msk.f32.gmra.mxu1 %vm329_vm1, %v3605_v50  ;;  %3163 = vmatprep.mubr.msk.f32.mxu0 %vm329_vm1, %v2640_v57 }
  0x7f   : > { %3137 = vmatprep.mubr.msk.f32.mxu1 %vm329_vm1, %v3611_v52 }
  0x81   : > { %3164 = vmatmul.mubr.msk.f32.gmra.mxu0 %vm329_vm1, %v2641_v59 }
  0x82   : > { %3138 = vmatmul.mubr.msk.f32.gmra.mxu1 %vm329_vm1, %v3625_v54  ;;  %3166 = vmatprep.mubr.msk.f32.mxu0 %vm329_vm1, %v2742_v62 }
  0x83   : > { %3140 = vmatprep.mubr.msk.f32.mxu1 %vm329_vm1, %v2708_v61 }
  0x85   : > { %3167 = vmatmul.mubr.msk.f32.gmra.mxu0 %vm329_vm1, %v2743_v0 }
  0x86   : > { %3141 = vmatmul.mubr.msk.f32.gmra.mxu1 %vm329_vm1, %v2709_v63  ;;  %3197 = vmatprep.mubr.msk.f32.mxu0 %vm329_vm1, %v3508_v32 }
  0x87   : > { %3171 = vmatprep.mubr.msk.f32.mxu1 %vm329_vm1, %v3425_v13 }
  0x89   : > { %3198 = vmatmul.mubr.msk.f32.vlgmr.msra.gmra.mxu0 %vm329_vm1, %v3525_v34 }
  0x8a   : > { %3172 = vmatmul.mubr.msk.f32.vlgmr.msra.gmra.mxu1 %vm329_vm1, %v3441_v15  ;;  %3200 = vmatprep.mubr.msk.f32.mxu0 %vm329_vm1, %v3531_v36 }
  0x8b   : > { %3174 = vmatprep.mubr.msk.f32.mxu1 %vm329_vm1, %v3447_v17 }
  0x8d   : > { %3201 = vmatmul.mubr.msk.f32.gmra.mxu0 %vm329_vm1, %v3545_v38 }
  0x8e   : > { %3175 = vmatmul.mubr.msk.f32.gmra.mxu1 %vm329_vm1, %v3461_v19  ;;  %3203 = vmatprep.mubr.msk.f32.mxu0 %vm329_vm1, %v3551_v40 }
  0x8f   : > { %3177 = vmatprep.mubr.msk.f32.mxu1 %vm329_vm1, %v3388_v4  ;;  %v2811_v4 = vld [vmem:[%s3384_s8 + $0xe2] sm:$0xff] }
  0x91   : > { %3204 = vmatmul.mubr.msk.f32.gmra.mxu0 %vm329_vm1, %v3565_v42 }
  0x92   : > { %3178 = vmatmul.mubr.msk.f32.gmra.mxu1 %vm329_vm1, %v3395_v6  ;;  %3206 = vmatprep.mubr.msk.f32.mxu0 %vm329_vm1, %v3571_v44 }
  0x93   : > { %3180 = vmatprep.mubr.msk.f32.mxu1 %vm329_vm1, %v3401_v8 }
  0x95   : > { %3207 = vmatmul.mubr.msk.f32.gmra.mxu0 %vm329_vm1, %v3585_v46 }
  0x96   : > { %3181 = vmatmul.mubr.msk.f32.gmra.mxu1 %vm329_vm1, %v3418_v12  ;;  %3209 = vmatprep.mubr.msk.f32.mxu0 %vm329_vm1, %v3591_v48 }
  0x97   : > { %3183 = vmatprep.mubr.msk.f32.mxu1 %vm329_vm1, %v3428_v14 }
  0x99   : > { %3210 = vmatmul.mubr.msk.f32.gmra.mxu0 %vm329_vm1, %v3605_v50 }
  0x9a   : > { %3184 = vmatmul.mubr.msk.f32.gmra.mxu1 %vm329_vm1, %v3444_v16  ;;  %3212 = vmatprep.mubr.msk.f32.mxu0 %vm329_vm1, %v3611_v52 }
  0x9b   : > { %3186 = vmatprep.mubr.msk.f32.mxu1 %vm329_vm1, %v3450_v18 }
  0x9d   : > { %3213 = vmatmul.mubr.msk.f32.gmra.mxu0 %vm329_vm1, %v3625_v54 }
  0x9e   : > { %3187 = vmatmul.mubr.msk.f32.gmra.mxu1 %vm329_vm1, %v3464_v20  ;;  %3215 = vmatprep.mubr.msk.f32.mxu0 %vm329_vm1, %v2708_v61 }
  0x9f   : > { %3189 = vmatprep.mubr.msk.f32.mxu1 %vm329_vm1, %v3696_v58 }
  0xa1   : > { %3216 = vmatmul.mubr.msk.f32.gmra.mxu0 %vm329_vm1, %v2709_v63 }
  0xa2   : > { %3190 = vmatmul.mubr.msk.f32.gmra.mxu1 %vm329_vm1, %v3707_v60  ;;  %3218 = vmatprep.mubr.msk.f32.mxu0 %vm329_vm1, %v2810_v2 }
  0xa3   : > { %3192 = vmatprep.mubr.msk.f32.mxu1 %vm329_vm1, %v2776_v1 }
  0xa5   : > { %3219 = vmatmul.mubr.msk.f32.gmra.mxu0 %vm329_vm1, %v2811_v4 }
  0xa6   : > { %3193 = vmatmul.mubr.msk.f32.gmra.mxu1 %vm329_vm1, %v2777_v3 }
  0xd9   : > { %v2991_v5 = vpop.f32.mrf.mxu0 }
  0xda   : > { %v3003_v6 = vpop.f32.mrf.mxu1 }
  0xdb   : > { %v448_v7 = vpop.f32.mrf.mxu0 }
  0xdc   : > { %v488_v8 = vpop.f32.mrf.mxu1 }
  0xdd   : > { %v2994_v9 = vpop.f32.mrf.mxu0 }
  0xde   : > { %v3006_v10 = vpop.f32.mrf.mxu1 }
  0xdf   : > { %v458_v11 = vpop.f32.mrf.mxu0 }
  0xe0   : > { %v498_v12 = vpop.f32.mrf.mxu1 }
  0xe1   : > { %v2997_v13 = vpop.f32.mrf.mxu0 }
  0xe2   : > { %v3009_v14 = vpop.f32.mrf.mxu1 }
  0xe3   : > { %v468_v15 = vpop.f32.mrf.mxu0 }
  0xe4   : > { %v508_v16 = vpop.f32.mrf.mxu1 }
  0xe5   : > { %v3000_v17 = vpop.f32.mrf.mxu0 }
  0xe6   : > { %v3012_v18 = vpop.f32.mrf.mxu1 }
  0xe7   : > { %v478_v19 = vpop.f32.mrf.mxu0 }
  0xe8   : > { %v3838_v20 = vpop.f32.mrf.mxu1 }
  0xe9   : > { %v3043_v22 = vpop.f32.mrf.mxu0 }
  0xea   : > { %v3017_v21 = vpop.f32.mrf.mxu1 }
  0xeb   : > { %v650_v23 = vadd.f32 %v3017_v21, %v2991_v5  ;;  %v858_v25 = vpop.f32.mrf.mxu0 }
  0xec   : > { %v644_v24 = vpop.f32.mrf.mxu1 }
  0xed   : > { %v3840_v26 = vadd.f32 %v3043_v22, %v650_v23  ;;  %v645_v27 = vadd.f32 %v644_v24, %v448_v7  ;;  %v3046_v29 = vpop.f32.mrf.mxu0 }
  0xee   : > { %v3020_v28 = vpop.f32.mrf.mxu1 }
  0xef   : > { %v3842_v30 = vadd.f32 %v858_v25, %v645_v27  ;;  %v660_v31 = vadd.f32 %v3020_v28, %v2994_v9  ;;  %v868_v33 = vpop.f32.mrf.mxu0 }
  0xf0   : > { %v654_v32 = vpop.f32.mrf.mxu1 }
  0xf1   : > { %v3844_v34 = vadd.f32 %v3046_v29, %v660_v31  ;;  %v655_v35 = vadd.f32 %v654_v32, %v458_v11  ;;  %v3049_v37 = vpop.f32.mrf.mxu0 }
  0xf2   : > { %v3023_v36 = vpop.f32.mrf.mxu1 }
  0xf3   : > { %v3846_v38 = vadd.f32 %v868_v33, %v655_v35  ;;  %v670_v39 = vadd.f32 %v3023_v36, %v2997_v13  ;;  %v878_v41 = vpop.f32.mrf.mxu0 }
  0xf4   : > { %v664_v40 = vpop.f32.mrf.mxu1 }
  0xf5   : > { %v3848_v42 = vadd.f32 %v3049_v37, %v670_v39  ;;  %v665_v43 = vadd.f32 %v664_v40, %v468_v15  ;;  %v3052_v45 = vpop.f32.mrf.mxu0 }
  0xf6   : > { %v3026_v44 = vpop.f32.mrf.mxu1 }
  0xf7   : > { %v3850_v46 = vadd.f32 %v878_v41, %v665_v43  ;;  %v680_v47 = vadd.f32 %v3026_v44, %v3000_v17  ;;  %v888_v49 = vpop.f32.mrf.mxu0 }
  0xf8   : > { %v674_v48 = vpop.f32.mrf.mxu1 }
  0xf9   : > { %v3852_v50 = vadd.f32 %v3052_v45, %v680_v47  ;;  %v675_v51 = vadd.f32 %v674_v48, %v478_v19  ;;  %v3055_v53 = vpop.f32.mrf.mxu0 }
  0xfa   : > { %v3029_v52 = vpop.f32.mrf.mxu1 }
  0xfb   : > { %v3854_v54 = vadd.f32 %v888_v49, %v675_v51  ;;  %v690_v55 = vadd.f32 %v3029_v52, %v3003_v6  ;;  %v898_v57 = vpop.f32.mrf.mxu0 }
  0xfc   : > { %v684_v56 = vpop.f32.mrf.mxu1 }
  0xfd   : > { %v3856_v58 = vadd.f32 %v3055_v53, %v690_v55  ;;  %v685_v59 = vadd.f32 %v684_v56, %v488_v8  ;;  %v3058_v61 = vpop.f32.mrf.mxu0 }
  0xfe   : > { %v3032_v60 = vpop.f32.mrf.mxu1 }
  0xff   : > { %v3858_v62 = vadd.f32 %v898_v57, %v685_v59  ;;  %v700_v63 = vadd.f32 %v3032_v60, %v3006_v10  ;;  %v908_v1 = vpop.f32.mrf.mxu0 }
 0x100   : > { %v694_v0 = vpop.f32.mrf.mxu1 }
 0x101   : > { %v3860_v2 = vadd.f32 %v3058_v61, %v700_v63  ;;  %v695_v3 = vadd.f32 %v694_v0, %v498_v12  ;;  %v3061_v5 = vpop.f32.mrf.mxu0 }
 0x102   : > { %v3035_v4 = vpop.f32.mrf.mxu1 }
 0x103   : > { %v3862_v7 = vadd.f32 %v908_v1, %v695_v3  ;;  %v710_v6 = vadd.f32 %v3035_v4, %v3009_v14  ;;  %v918_v11 = vpop.f32.mrf.mxu0 }
 0x104   : > { %v704_v9 = vpop.f32.mrf.mxu1 }
 0x105   : > { %v3864_v13 = vadd.f32 %v3061_v5, %v710_v6  ;;  %v705_v8 = vadd.f32 %v704_v9, %v508_v16  ;;  %v3064_v17 = vpop.f32.mrf.mxu0 }
 0x106   : > { %v3038_v15 = vpop.f32.mrf.mxu1 }
 0x107   : > { %v3866_v19 = vadd.f32 %v918_v11, %v705_v8  ;;  %v720_v10 = vadd.f32 %v3038_v15, %v3012_v18  ;;  %v928_v22 = vpop.f32.mrf.mxu0 }
 0x108   : > { %v714_v21 = vpop.f32.mrf.mxu1 }
 0x109   : > { %v3868_v23 = vadd.f32 %v3064_v17, %v720_v10  ;;  %v715_v12 = vadd.f32 %v714_v21, %v3838_v20  ;;  %v3095_v25 = vpop.f32.mrf.mxu0 }
 0x10a   : > { %v3069_v24 = vpop.f32.mrf.mxu1 }
 0x10b   : > { %4121 = vst [vmem:[#allocation2_spill] sm:$0xff] %v3868_v23  ;;  %v3871_v27 = vadd.f32 %v928_v22, %v715_v12  ;;  %v1319_v28 = vpop.f32.mrf.mxu0 }
 0x10c   : > { %v1089_v14 = vpop.f32.mrf.mxu1 }
 0x10d   : > { %4122 = vst [vmem:[#allocation3_spill] sm:$0xff] %v3871_v27  ;;  %v3873_v31 = vpop.f32.mrf.mxu0 }
 0x10e   : > { %v3072_v29 = vpop.f32.mrf.mxu1 }
 0x10f   : > { %v3875_v32 = vpop.f32.mrf.mxu0 }
 0x110   : > { %v1099_v16 = vpop.f32.mrf.mxu1 }
 0x111   : > { %v3879_v18 = vpop.f32.mrf.mxu0 }
 0x112   : > { %v3877_v33 = vpop.f32.mrf.mxu1 }
 0x113   : > { %v3881_v36 = vpop.f32.mrf.mxu0 }
 0x114   : > { %v1109_v35 = vpop.f32.mrf.mxu1 }
 0x115   : > { %v3883_v37 = vpop.f32.mrf.mxu0 }
 0x116   : > { %v3078_v20 = vpop.f32.mrf.mxu1 }
 0x117   : > { %v3887_v40 = vpop.f32.mrf.mxu0 }
 0x118   : > { %v3885_v39 = vpop.f32.mrf.mxu1 }
 0x119   : > { %v3891_v43 = vpop.f32.mrf.mxu0 }
 0x11a   : > { %v3889_v41 = vpop.f32.mrf.mxu1 }
 0x11b   : > { %v3895_v45 = vpop.f32.mrf.mxu0 }
 0x11c   : > { %v3893_v44 = vpop.f32.mrf.mxu1 }
 0x11d   : > { %v3899_v48 = vpop.f32.mrf.mxu0 }
 0x11e   : > { %v3897_v47 = vpop.f32.mrf.mxu1 }
 0x11f   : > { %v3903_v51 = vpop.f32.mrf.mxu0 }
 0x120   : > { %v3901_v49 = vpop.f32.mrf.mxu1  ;;  %4123 = vst [vmem:[#allocation4_spill] sm:$0xff] %v3903_v51 }
 0x121   : > { %v3907_v53 = vpop.f32.mrf.mxu0 }
 0x122   : > { %v3905_v52 = vpop.f32.mrf.mxu1  ;;  %4124 = vst [vmem:[#allocation5_spill] sm:$0xff] %v3907_v53 }
 0x123   : > { %v3911_v56 = vpop.f32.mrf.mxu0 }
 0x124   : > { %v3909_v55 = vpop.f32.mrf.mxu1  ;;  %4125 = vst [vmem:[#allocation6_spill] sm:$0xff] %v3911_v56  ;;  %v1169_v56 = vadd.f32 %v3069_v24, %v3840_v26  ;;  %v1170_v26 = vadd.f32 %v1099_v16, %v3846_v38  ;;  %v1174_v16 = vadd.f32 %v3885_v39, %v3854_v54  ;;  %v1179_v39 = vadd.f32 %v3897_v47, %v3860_v2 }
 0x125   : > { %v3915_v59 = vpop.f32.mrf.mxu0 }
 0x126   : > { %v3913_v57 = vpop.f32.mrf.mxu1  ;;  %4127 = vst [vmem:[#allocation8_spill] sm:$0xff] %v3915_v59  ;;  %v1400_v38 = vadd.f32 %v3875_v32, %v1170_v26 }
 0x127   : > { %4126 = vst [vmem:[#allocation7_spill] sm:$0xff] %v3913_v57  ;;  %v3919_v61 = vpop.f32.mrf.mxu0 }
 0x128   : > { %v3917_v60 = vpop.f32.mrf.mxu1  ;;  %4129 = vst [vmem:[#allocation10_spill] sm:$0xff] %v3919_v61 }
 0x129   : > { %4128 = vst [vmem:[#allocation9_spill] sm:$0xff] %v3917_v60  ;;  %v3147_v0 = vpop.f32.mrf.mxu0 }
 0x12a   : > { %v3121_v63 = vpop.f32.mrf.mxu1 }
 0x12b   : > { %v1780_v3 = vpop.f32.mrf.mxu0 }
 0x12c   : > { %v1549_v1 = vpop.f32.mrf.mxu1 }
 0x12d   : > { %v3150_v5 = vpop.f32.mrf.mxu0 }
 0x12e   : > { %v3124_v4 = vpop.f32.mrf.mxu1 }
 0x12f   : > { %v3921_v9 = vpop.f32.mrf.mxu0 }
 0x130   : > { %v1559_v6 = vpop.f32.mrf.mxu1 }
 0x131   : > { %v3925_v8 = vpop.f32.mrf.mxu0 }
 0x132   : > { %v3923_v11 = vpop.f32.mrf.mxu1 }
 0x133   : > { %v3927_v17 = vpop.f32.mrf.mxu0 }
 0x134   : > { %v1569_v15 = vpop.f32.mrf.mxu1 }
 0x135   : > { %v3931_v21 = vpop.f32.mrf.mxu0 }
 0x136   : > { %v3929_v10 = vpop.f32.mrf.mxu1  ;;  %4130 = vst [vmem:[#allocation11_spill] sm:$0xff] %v3931_v21 }
 0x137   : > { %v3935_v12 = vpop.f32.mrf.mxu0 }
 0x138   : > { %v3933_v22 = vpop.f32.mrf.mxu1  ;;  %4131 = vst [vmem:[#allocation12_spill] sm:$0xff] %v3935_v12  ;;  %v1168_v12 = vadd.f32 %v1089_v14, %v3842_v30 }
 0x139   : > { %v3939_v59 = vpop.f32.mrf.mxu0 }
 0x13a   : > { %v3937_v61 = vpop.f32.mrf.mxu1  ;;  %4133 = vst [vmem:[#allocation14_spill] sm:$0xff] %v3939_v59  ;;  %v1399_v59 = vadd.f32 %v3095_v25, %v1169_v56  ;;  %v1172_v25 = vadd.f32 %v1109_v35, %v3850_v46  ;;  %v1176_v46 = vadd.f32 %v3893_v44, %v3858_v62  ;;  %v1404_v44 = vadd.f32 %v3887_v40, %v1174_v16 }
 0x13b   : > { %4132 = vst [vmem:[#allocation13_spill] sm:$0xff] %v3937_v61  ;;  %v3943_v27 = vpop.f32.mrf.mxu0 }
 0x13c   : > { %v3941_v60 = vpop.f32.mrf.mxu1  ;;  %4135 = vst [vmem:[#allocation16_spill] sm:$0xff] %v3943_v27  ;;  %v1629_v24 = vadd.f32 %v3121_v63, %v1399_v59 }
 0x13d   : > { %4134 = vst [vmem:[#allocation15_spill] sm:$0xff] %v3941_v60  ;;  %v3947_v23 = vpop.f32.mrf.mxu0  ;;  %v1171_v60 = vadd.f32 %v3072_v29, %v3844_v34  ;;  %v1173_v34 = vadd.f32 %v3877_v33, %v3848_v42  ;;  %v1175_v29 = vadd.f32 %v3078_v20, %v3852_v50  ;;  %v1177_v42 = vadd.f32 %v3889_v41, %v3856_v58  ;;  %v3997_v58 = vld [vmem:[%s4118_s2] ss:$0 sm:$0xff]  ;;  %v4141_v16 = vld [vmem:[#allocation11_spill] sm:$0xff] }
 0x13e   : > { %v3945_v57 = vpop.f32.mrf.mxu1  ;;  %4137 = vst [vmem:[#allocation18_spill] sm:$0xff] %v3947_v23  ;;  %v1398_v23 = vadd.f32 %v1319_v28, %v1168_v12  ;;  %v1860_v59 = vadd.f32 %v3147_v0, %v1629_v24  ;;  %v1630_v33 = vadd.f32 %v1559_v6, %v1400_v38  ;;  %v1402_v20 = vadd.f32 %v3881_v36, %v1172_v25  ;;  %v4006_v0 = vld [vmem:[%s4119_s3] ss:$0 sm:$0xff] }
 0x13f   : > { %4136 = vst [vmem:[#allocation17_spill] sm:$0xff] %v3945_v57  ;;  %v3952_v21 = vpop.f32.mrf.mxu0  ;;  %v1401_v14 = vadd.f32 %v3873_v31, %v1171_v60  ;;  %v1403_v32 = vadd.f32 %v3879_v18, %v1173_v34  ;;  %v1405_v54 = vadd.f32 %v3883_v37, %v1175_v29  ;;  %v1407_v37 = vadd.f32 %v3891_v43, %v1177_v42 }
 0x140   : > { %v3950_v53 = vpop.f32.mrf.mxu1  ;;  %4138 = vst [vmem:[#allocation19_spill] sm:$0xff] %v3952_v21  ;;  %v1632_v47 = vadd.f32 %v1569_v15, %v1402_v20  ;;  %v1409_v43 = vadd.f32 %v3899_v48, %v1179_v39  ;;  %v1180_v25 = vadd.f32 %v3909_v55, %v3866_v19  ;;  %v4140_v55 = vld [vmem:[#allocation4_spill] sm:$0xff]  ;;  %v4144_v20 = vld [vmem:[#allocation6_spill] sm:$0xff] }
 0x141   : > { %v3957_v61 = vpop.f32.mrf.mxu0  ;;  %v1631_v63 = vadd.f32 %v3124_v4, %v1401_v14  ;;  %v1633_v2 = vadd.f32 %v3923_v11, %v1403_v32  ;;  %v1861_v4 = vadd.f32 %v3921_v9, %v1630_v33  ;;  %v1181_v11 = vadd.f32 %v3905_v52, %v3864_v13  ;;  %v4145_v39 = vld [vmem:[#allocation12_spill] sm:$0xff] }
 0x142   : > { %v3955_v51 = vpop.f32.mrf.mxu1  ;;  %4139 = vst [vmem:[#allocation20_spill] sm:$0xff] %v3957_v61  ;;  %v1628_v61 = vadd.f32 %v1549_v1, %v1398_v23  ;;  %v1635_v15 = vadd.f32 %v3929_v10, %v1405_v54  ;;  %v1410_v54 = vadd.f32 %v4144_v20, %v1180_v25  ;;  %v4151_v25 = vld [vmem:[#allocation3_spill] sm:$0xff] }
 0x143   : > { %v3962_v57 = vpop.f32.mrf.mxu0  ;;  %v1862_v18 = vadd.f32 %v3150_v5, %v1631_v63  ;;  %v1864_v48 = vadd.f32 %v3925_v8, %v1633_v2 }
 0x144   : > { %v3960_v27 = vpop.f32.mrf.mxu1  ;;  %v1859_v31 = vadd.f32 %v1780_v3, %v1628_v61  ;;  %v1406_v61 = vadd.f32 %v3895_v45, %v1176_v46  ;;  %v1178_v45 = vadd.f32 %v3901_v49, %v3862_v7  ;;  %v1863_v7 = vadd.f32 %v3927_v17, %v1632_v47  ;;  %v4146_v47 = vld [vmem:[#allocation14_spill] sm:$0xff] }
 0x145   : > { %v3967_v30 = vpop.f32.mrf.mxu0  ;;  %v1634_v49 = vadd.f32 %v3933_v22, %v1404_v44  ;;  %v1866_v17 = vadd.f32 %v4141_v16, %v1635_v15  ;;  %v4154_v16 = vld [vmem:[#allocation18_spill] sm:$0xff] }
 0x146   : > { %v3965_v21 = vpop.f32.mrf.mxu1  ;;  %v1408_v8 = vadd.f32 %v4140_v55, %v1178_v45 }
 0x147   : > { %v3976_v56 = vpop.f32.mrf.mxu0 }
 0x148   : > { %v3974_v28 = vpop.f32.mrf.mxu1 }
 0x149   : > { %v3199_v23 = vpop.f32.mrf.mxu0 }
 0x14a   : > { %v3173_v50 = vpop.f32.mrf.mxu1 }
 0x14b   : > { %v2090_v35 = vadd.f32 %v3173_v50, %v1860_v59  ;;  %v2240_v41 = vpop.f32.mrf.mxu0  ;;  %v4142_v59 = vld [vmem:[#allocation13_spill] sm:$0xff] }
 0x14c   : > { %v2010_v62 = vpop.f32.mrf.mxu1  ;;  %v1637_v22 = vadd.f32 %v4142_v59, %v1407_v37 }
 0x14d   : > { %v2320_v60 = vadd.f32 %v3199_v23, %v2090_v35  ;;  %v2089_v36 = vadd.f32 %v2010_v62, %v1859_v31  ;;  %v3202_v3 = vpop.f32.mrf.mxu0  ;;  %v4143_v35 = vld [vmem:[#allocation5_spill] sm:$0xff]  ;;  %v1865_v62 = vadd.f32 %v4145_v39, %v1634_v49 }
 0x14e   : > { %v3176_v1 = vpop.f32.mrf.mxu1  ;;  %v1411_v32 = vadd.f32 %v4143_v35, %v1181_v11 }
 0x14f   : > { %v2343_v40 = vmul.f32 %v3997_v58, %v2320_v60  ;;  %v2319_v5 = vadd.f32 %v2240_v41, %v2089_v36  ;;  %v2092_v6 = vadd.f32 %v3176_v1, %v1862_v18  ;;  %v2250_v26 = vpop.f32.mrf.mxu0  ;;  %v1868_v1 = vadd.f32 %v4146_v47, %v1637_v22 }
 0x150   : > { %v2020_v12 = vpop.f32.mrf.mxu1  ;;  %v1641_v59 = vadd.f32 %v3955_v51, %v1411_v32 }
 0x151   : > { %v2366_v24 = vadd.f32 %v4006_v0, %v2343_v40  ;;  %v2342_v9 = vmul.f32 %v3997_v58, %v2319_v5  ;;  %v2322_v14 = vadd.f32 %v3202_v3, %v2092_v6  ;;  %v2091_v34 = vadd.f32 %v2020_v12, %v1861_v4  ;;  %v3205_v52 = vpop.f32.mrf.mxu0  ;;  %v4147_v3 = vld [vmem:[#allocation15_spill] sm:$0xff]  ;;  %v4148_v40 = vld [vmem:[#allocation17_spill] sm:$0xff] }
 0x152   : > { %v3179_v13 = vpop.f32.mrf.mxu1  ;;  %v1636_v4 = vadd.f32 %v4147_v3, %v1406_v61  ;;  %v1639_v5 = vadd.f32 %v4148_v40, %v1409_v43  ;;  %v1638_v61 = vadd.f32 %v3950_v53, %v1408_v8 }
 0x153   : > { %v2382_v10 = vmax.f32 %v2366_v24, 0.0  ;;  %v2365_v29 = vadd.f32 %v4006_v0, %v2342_v9  ;;  %v2345_v38 = vmul.f32 %v3997_v58, %v2322_v14  ;;  %v2321_v19 = vadd.f32 %v2250_v26, %v2091_v34  ;;  %v2260_v46 = vpop.f32.mrf.mxu0  ;;  %v4149_v9 = vld [vmem:[#allocation2_spill] sm:$0xff]  ;;  %v4150_v14 = vld [vmem:[#allocation7_spill] sm:$0xff] }
 0x154   : > { %v2094_v63 = vadd.f32 %v3179_v13, %v1864_v48  ;;  %v2030_v42 = vpop.f32.mrf.mxu1  ;;  %v1183_v34 = vadd.f32 %v4150_v14, %v4149_v9  ;;  %v4152_v48 = vld [vmem:[#allocation9_spill] sm:$0xff] }
 0x155   : > { %2398 = vst [vmem:[%s4027_s10 + $0x8] sm:$0xff] %v2382_v10  ;;  %v2381_v50 = vmax.f32 %v2365_v29, 0.0  ;;  %v2368_v23 = vadd.f32 %v4006_v0, %v2345_v38  ;;  %v2344_v31 = vmul.f32 %v3997_v58, %v2321_v19  ;;  %v2093_v33 = vadd.f32 %v2030_v42, %v1863_v7  ;;  %v3208_v18 = vpop.f32.mrf.mxu0  ;;  %v4153_v19 = vld [vmem:[#allocation16_spill] sm:$0xff] }
 0x156   : > { %v2324_v41 = vadd.f32 %v3205_v52, %v2094_v63  ;;  %v3182_v44 = vpop.f32.mrf.mxu1  ;;  %v1182_v7 = vadd.f32 %v4152_v48, %v4151_v25  ;;  %v1867_v55 = vadd.f32 %v4153_v19, %v1636_v4 }
 0x157   : > { %2397 = vst [vmem:[%s4027_s10] sm:$0xff] %v2381_v50  ;;  %v2384_v60 = vmax.f32 %v2368_v23, 0.0  ;;  %v2367_v36 = vadd.f32 %v4006_v0, %v2344_v31  ;;  %v2323_v37 = vadd.f32 %v2260_v46, %v2093_v33  ;;  %v2096_v2 = vadd.f32 %v3182_v44, %v1866_v17  ;;  %v2270_v11 = vpop.f32.mrf.mxu0  ;;  %v4155_v23 = vld [vmem:[#allocation19_spill] sm:$0xff]  ;;  %v4156_v44 = vld [vmem:[#allocation8_spill] sm:$0xff] }
 0x158   : > { %v2347_v6 = vmul.f32 %v3997_v58, %v2324_v41  ;;  %v2040_v45 = vpop.f32.mrf.mxu1  ;;  %v1870_v17 = vadd.f32 %v4154_v16, %v1639_v5  ;;  %v1869_v31 = vadd.f32 %v4155_v23, %v1638_v61  ;;  %v1640_v33 = vadd.f32 %v3960_v27, %v1410_v54 }
 0x159   : > { %2400 = vst [vmem:[%s4027_s10 + $0x18] sm:$0xff] %v2384_v60  ;;  %v2383_v15 = vmax.f32 %v2367_v36, 0.0  ;;  %v2346_v12 = vmul.f32 %v3997_v58, %v2323_v37  ;;  %v2326_v26 = vadd.f32 %v3208_v18, %v2096_v2  ;;  %v2095_v24 = vadd.f32 %v2040_v45, %v1865_v62  ;;  %v3211_v13 = vpop.f32.mrf.mxu0  ;;  %v4157_v60 = vld [vmem:[#allocation10_spill] sm:$0xff]  ;;  %v4158_v37 = vld [vmem:[#allocation20_spill] sm:$0xff] }
 0x15a   : > { %v2370_v43 = vadd.f32 %v4006_v0, %v2347_v6  ;;  %v3185_v49 = vpop.f32.mrf.mxu1  ;;  %v1413_v18 = vadd.f32 %v4156_v44, %v1183_v34  ;;  %v1412_v36 = vadd.f32 %v4157_v60, %v1182_v7  ;;  %v1872_v2 = vadd.f32 %v4158_v37, %v1641_v59 }
 0x15b   : > { %2399 = vst [vmem:[%s4027_s10 + $0x10] sm:$0xff] %v2383_v15  ;;  %v2369_v52 = vadd.f32 %v4006_v0, %v2346_v12  ;;  %v2349_v10 = vmul.f32 %v3997_v58, %v2326_v26  ;;  %v2325_v29 = vadd.f32 %v2270_v11, %v2095_v24  ;;  %v2098_v38 = vadd.f32 %v3185_v49, %v1868_v1  ;;  %v2280_v22 = vpop.f32.mrf.mxu0 }
 0x15c   : > { %v2386_v53 = vmax.f32 %v2370_v43, 0.0  ;;  %v2050_v8 = vpop.f32.mrf.mxu1  ;;  %v1871_v5 = vadd.f32 %v3962_v57, %v1640_v33  ;;  %v1643_v6 = vadd.f32 %v3965_v21, %v1413_v18  ;;  %v1642_v45 = vadd.f32 %v3974_v28, %v1412_v36 }
 0x15d   : > { %v2385_v63 = vmax.f32 %v2369_v52, 0.0  ;;  %v2372_v42 = vadd.f32 %v4006_v0, %v2349_v10  ;;  %v2348_v46 = vmul.f32 %v3997_v58, %v2325_v29  ;;  %v2328_v50 = vadd.f32 %v3211_v13, %v2098_v38  ;;  %v3214_v39 = vpop.f32.mrf.mxu0 }
 0x15e   : > { %2402 = vst [vmem:[%s4027_s10 + $0x28] sm:$0xff] %v2386_v53  ;;  %v2097_v35 = vadd.f32 %v2050_v8, %v1867_v55  ;;  %v3188_v20 = vpop.f32.mrf.mxu1  ;;  %v1874_v61 = vadd.f32 %v3967_v30, %v1643_v6  ;;  %v1873_v43 = vadd.f32 %v3976_v56, %v1642_v45 }
 0x15f   : > { %2401 = vst [vmem:[%s4027_s10 + $0x20] sm:$0xff] %v2385_v63  ;;  %v2388_v51 = vmax.f32 %v2372_v42, 0.0  ;;  %v2371_v32 = vadd.f32 %v4006_v0, %v2348_v46  ;;  %v2351_v62 = vmul.f32 %v3997_v58, %v2328_v50  ;;  %v2100_v41 = vadd.f32 %v3188_v20, %v1870_v17  ;;  %v2290_v47 = vpop.f32.mrf.mxu0 }
 0x160   : > { %v2327_v27 = vadd.f32 %v2280_v22, %v2097_v35  ;;  %v2060_v54 = vpop.f32.mrf.mxu1 }
 0x161   : > { %2404 = vst [vmem:[%s4027_s10 + $0x38] sm:$0xff] %v2388_v51  ;;  %v2387_v1 = vmax.f32 %v2371_v32, 0.0  ;;  %v2374_v3 = vadd.f32 %v4006_v0, %v2351_v62  ;;  %v2330_v4 = vadd.f32 %v3214_v39, %v2100_v41  ;;  %v2099_v40 = vadd.f32 %v2060_v54, %v1869_v31  ;;  %v3217_v12 = vpop.f32.mrf.mxu0 }
 0x162   : > { %v2350_v11 = vmul.f32 %v3997_v58, %v2327_v27  ;;  %v3191_v15 = vpop.f32.mrf.mxu1 }
 0x163   : > { %2403 = vst [vmem:[%s4027_s10 + $0x30] sm:$0xff] %v2387_v1  ;;  %v2390_v26 = vmax.f32 %v2374_v3, 0.0  ;;  %v2353_v24 = vmul.f32 %v3997_v58, %v2330_v4  ;;  %v2329_v9 = vadd.f32 %v2290_v47, %v2099_v40  ;;  %v2102_v14 = vadd.f32 %v3191_v15, %v1872_v2  ;;  %v2300_v48 = vpop.f32.mrf.mxu0 }
 0x164   : > { %v2373_v34 = vadd.f32 %v4006_v0, %v2350_v11  ;;  %v2070_v25 = vpop.f32.mrf.mxu1 }
 0x165   : > { %2406 = vst [vmem:[%s4027_s10 + $0x48] sm:$0xff] %v2390_v26  ;;  %v2376_v57 = vadd.f32 %v4006_v0, %v2353_v24  ;;  %v2352_v21 = vmul.f32 %v3997_v58, %v2329_v9  ;;  %v2332_v28 = vadd.f32 %v3217_v12, %v2102_v14  ;;  %v2101_v7 = vadd.f32 %v2070_v25, %v1871_v5  ;;  %v3220_v52 = vpop.f32.mrf.mxu0 }
 0x166   : > { %v2389_v49 = vmax.f32 %v2373_v34, 0.0  ;;  %v3194_v13 = vpop.f32.mrf.mxu1 }
 0x167   : > { %v2392_v10 = vmax.f32 %v2376_v57, 0.0  ;;  %v2375_v29 = vadd.f32 %v4006_v0, %v2352_v21  ;;  %v2355_v38 = vmul.f32 %v3997_v58, %v2332_v28  ;;  %v2331_v19 = vadd.f32 %v2300_v48, %v2101_v7  ;;  %v2310_v8 = vpop.f32.mrf.mxu0 }
 0x168   : > { %2405 = vst [vmem:[%s4027_s10 + $0x40] sm:$0xff] %v2389_v49  ;;  %v2104_v55 = vadd.f32 %v3194_v13, %v1874_v61  ;;  %v2080_v16 = vpop.f32.mrf.mxu1 }
 0x169   : > { %2408 = vst [vmem:[%s4027_s10 + $0x58] sm:$0xff] %v2392_v10  ;;  %v2391_v17 = vmax.f32 %v2375_v29, 0.0  ;;  %v2378_v30 = vadd.f32 %v4006_v0, %v2355_v38  ;;  %v2354_v56 = vmul.f32 %v3997_v58, %v2331_v19  ;;  %v2103_v59 = vadd.f32 %v2080_v16, %v1873_v43 }
 0x16a   : > { %v2334_v53 = vadd.f32 %v3220_v52, %v2104_v55 }
 0x16b   : > { %2407 = vst [vmem:[%s4027_s10 + $0x50] sm:$0xff] %v2391_v17  ;;  %v2394_v22 = vmax.f32 %v2378_v30, 0.0  ;;  %v2377_v63 = vadd.f32 %v4006_v0, %v2354_v56  ;;  %v2333_v42 = vadd.f32 %v2310_v8, %v2103_v59 }
 0x16c   : > { %v2357_v46 = vmul.f32 %v3997_v58, %v2334_v53 }
 0x16d   : > { %2410 = vst [vmem:[%s4027_s10 + $0x68] sm:$0xff] %v2394_v22  ;;  %v2393_v50 = vmax.f32 %v2377_v63, 0.0  ;;  %v2356_v23 = vmul.f32 %v3997_v58, %v2333_v42 }
 0x16e   : > { %v2380_v31 = vadd.f32 %v4006_v0, %v2357_v46 }
 0x16f   : > { %2409 = vst [vmem:[%s4027_s10 + $0x60] sm:$0xff] %v2393_v50  ;;  %v2379_v33 = vadd.f32 %v4006_v0, %v2356_v23 }
 0x170   : > { %v2396_v35 = vmax.f32 %v2380_v31, 0.0 }
 0x171   : > { %v2395_v20 = vmax.f32 %v2379_v33, 0.0 }
 0x172   : > { %2412 = vst [vmem:[%s4027_s10 + $0x78] sm:$0xff] %v2396_v35 }
 0x173   : > { %2411 = vst [vmem:[%s4027_s10 + $0x70] sm:$0xff] %v2395_v20 }
 0x174 PF: > { %s14_s19 = sadd.s32 1, %s3303_s19   ;;  %s4159_s15 = smov %s3295_s17 }
 0x175   : > { %p11_p7 = scmp.ge.s32.totalorder %s14_s19, 6   ;;  %s4160_s16 = smov %s3299_s18 }
 0x176   : > { %s4161_s17 = smov %s4164_s20  ;;  %s4162_s18 = smov %s4168_s21 }
 0x177   :  { %13 = sbr.rel (!%p11_p7) target bundleno = 3 (0x3), region = 85 }

</bundles_post_ra>
